<compile_context>
chip_gen: v7x
topology: tpu7x:2x2x1
jax: 0.10.0
libtpu: 0.0.40
codegen_flags: <defaults>
</compile_context>

<pallas_src>
import jax
import jax.numpy as jnp
from jax.experimental import pallas as pl
from jax.experimental.pallas import tpu as pltpu

# ---------------- small, module-consistent shapes ----------------
BATCH = 8
TOPOLOGY = [32, 64, 64, 128]   # 3 x (ReLU -> Linear); lane-dense 128-wide output
NUM_LAYERS = len(TOPOLOGY) - 1


# ---------------- fused kernel: the entire forward pass ----------------
def mlp_kernel(x_ref, *refs):
    # refs = (w0, b0, w1, b1, ..., w_{L-1}, b_{L-1}, out_ref)
    out_ref = refs[-1]
    w_and_b = refs[:-1]

    x = x_ref[...]                                   # (B, topology[0]) f32, in VMEM
    for i in range(NUM_LAYERS):                      # static Python loop -> fully unrolled
        w = w_and_b[2 * i][...]                      # (in_i, out_i)
        b = w_and_b[2 * i + 1][...]                  # (1, out_i)
        x = jnp.maximum(x, 0.0)                      # nn.ReLU()
        x = jnp.dot(x, w, preferred_element_type=jnp.float32) + b   # nn.Linear
    out_ref[...] = x                                 # (B, topology[-1]), lane-dense


def linear_constructor_forward(x, params):
    """x: (B, topology[0]) f32; params: list of (W(in,out), b(1,out)) per layer."""
    flat = []
    for w, b in params:
        flat.extend([w, b])

    out_dim = params[-1][0].shape[1]
    vmem = pl.BlockSpec(memory_space=pltpu.MemorySpace.VMEM)

    return pl.pallas_call(
        mlp_kernel,
        out_shape=jax.ShapeDtypeStruct((x.shape[0], out_dim), jnp.float32),
        # single launch, no grid: all inputs/weights resident in VMEM for the
        # whole (tiny) forward pass
        in_specs=[vmem] * (1 + len(flat)),
        out_specs=vmem,
    )(x, *flat)


# ---------------- deterministic synthetic weights ----------------
def init_params(key, topology):
    params = []
    keys = jax.random.split(key, len(topology) - 1)
    for n in range(len(topology) - 1):
        fan_in, fan_out = topology[n], topology[n + 1]
        bound = 1.0 / (fan_in ** 0.5)
        kw, kb = jax.random.split(keys[n])
        # stored as (in, out) == PyTorch weight.T, so the kernel does x @ W + b
        w = jax.random.uniform(kw, (fan_in, fan_out), jnp.float32, -bound, bound)
        b = jax.random.uniform(kb, (1, fan_out), jnp.float32, -bound, bound)
        params.append((w, b))
    return params


if __name__ == "__main__":
    key = jax.random.PRNGKey(0)
    kx, kp = jax.random.split(key)

    x = jax.random.normal(kx, (BATCH, TOPOLOGY[0]), dtype=jnp.float32)
    params = init_params(kp, TOPOLOGY)

    out = linear_constructor_forward(x, params)
    out = jax.block_until_ready(out)
    assert out.shape == (BATCH, TOPOLOGY[-1]), out.shape

    # correctness check against a pure-JAX reference of the PyTorch forward
    ref = x
    for w, b in params:
        ref = jnp.maximum(ref, 0.0) @ w + b
    assert jnp.allclose(out, ref, atol=1e-5, rtol=1e-5)

    print("KERNEL_OK")
</pallas_src>

<mosaic_0001>
module attributes {stable_mosaic.version = 11 : i64} {
  func.func @mlp_kernel(%arg0: memref<8x32xf32, #tpu.memory_space<vmem>>, %arg1: memref<32x64xf32, #tpu.memory_space<vmem>>, %arg2: memref<1x64xf32, #tpu.memory_space<vmem>>, %arg3: memref<64x64xf32, #tpu.memory_space<vmem>>, %arg4: memref<1x64xf32, #tpu.memory_space<vmem>>, %arg5: memref<64x128xf32, #tpu.memory_space<vmem>>, %arg6: memref<1x128xf32, #tpu.memory_space<vmem>>, %arg7: memref<8x128xf32, #tpu.memory_space<vmem>>) attributes {dimension_semantics = [], scalar_prefetch = 0 : i64, scratch_operands = 0 : i64, tpu.core_type = #tpu.core_type<tc>} {
    %c0 = arith.constant 0 : index
    %c0_0 = arith.constant 0 : index
    %0 = vector.load %arg0[%c0, %c0_0] : memref<8x32xf32, #tpu.memory_space<vmem>>, vector<8x32xf32>
    %c0_1 = arith.constant 0 : index
    %c0_2 = arith.constant 0 : index
    %1 = vector.load %arg1[%c0_1, %c0_2] : memref<32x64xf32, #tpu.memory_space<vmem>>, vector<32x64xf32>
    %c0_3 = arith.constant 0 : index
    %c0_4 = arith.constant 0 : index
    %2 = vector.load %arg2[%c0_3, %c0_4] : memref<1x64xf32, #tpu.memory_space<vmem>>, vector<1x64xf32>
    %cst = arith.constant 0.000000e+00 : f32
    %3 = vector.broadcast %cst : f32 to vector<8x32xf32>
    %4 = arith.maximumf %0, %3 : vector<8x32xf32>
    %cst_5 = arith.constant dense<0.000000e+00> : vector<8x64xf32>
    %5 = tpu.matmul %4, %1, %cst_5 {dimension_numbers = #tpu.dot_dimension_numbers<[1], [0], [0], [1], [0, 0, 1, 1], [], []>} : vector<8x32xf32>, vector<32x64xf32>, vector<8x64xf32> -> vector<8x64xf32>
    %6 = vector.broadcast %2 : vector<1x64xf32> to vector<8x64xf32>
    %7 = arith.addf %5, %6 : vector<8x64xf32>
    %c0_6 = arith.constant 0 : index
    %c0_7 = arith.constant 0 : index
    %8 = vector.load %arg3[%c0_6, %c0_7] : memref<64x64xf32, #tpu.memory_space<vmem>>, vector<64x64xf32>
    %c0_8 = arith.constant 0 : index
    %c0_9 = arith.constant 0 : index
    %9 = vector.load %arg4[%c0_8, %c0_9] : memref<1x64xf32, #tpu.memory_space<vmem>>, vector<1x64xf32>
    %cst_10 = arith.constant 0.000000e+00 : f32
    %10 = vector.broadcast %cst_10 : f32 to vector<8x64xf32>
    %11 = arith.maximumf %7, %10 : vector<8x64xf32>
    %cst_11 = arith.constant dense<0.000000e+00> : vector<8x64xf32>
    %12 = tpu.matmul %11, %8, %cst_11 {dimension_numbers = #tpu.dot_dimension_numbers<[1], [0], [0], [1], [0, 0, 1, 1], [], []>} : vector<8x64xf32>, vector<64x64xf32>, vector<8x64xf32> -> vector<8x64xf32>
    %13 = vector.broadcast %9 : vector<1x64xf32> to vector<8x64xf32>
    %14 = arith.addf %12, %13 : vector<8x64xf32>
    %c0_12 = arith.constant 0 : index
    %c0_13 = arith.constant 0 : index
    %15 = vector.load %arg5[%c0_12, %c0_13] : memref<64x128xf32, #tpu.memory_space<vmem>>, vector<64x128xf32>
    %c0_14 = arith.constant 0 : index
    %c0_15 = arith.constant 0 : index
    %16 = vector.load %arg6[%c0_14, %c0_15] : memref<1x128xf32, #tpu.memory_space<vmem>>, vector<1x128xf32>
    %cst_16 = arith.constant 0.000000e+00 : f32
    %17 = vector.broadcast %cst_16 : f32 to vector<8x64xf32>
    %18 = arith.maximumf %14, %17 : vector<8x64xf32>
    %cst_17 = arith.constant dense<0.000000e+00> : vector<8x128xf32>
    %19 = tpu.matmul %18, %15, %cst_17 {dimension_numbers = #tpu.dot_dimension_numbers<[1], [0], [0], [1], [0, 0, 1, 1], [], []>} : vector<8x64xf32>, vector<64x128xf32>, vector<8x128xf32> -> vector<8x128xf32>
    %20 = vector.broadcast %16 : vector<1x128xf32> to vector<8x128xf32>
    %21 = arith.addf %19, %20 : vector<8x128xf32>
    %c0_18 = arith.constant 0 : index
    %c0_19 = arith.constant 0 : index
    %22 = vector.load %arg7[%c0_18, %c0_19] : memref<8x128xf32, #tpu.memory_space<vmem>>, vector<8x128xf32>
    tpu.vector_store %arg7[%c0_18, %c0_19], %21 {strides = array<i32>} : memref<8x128xf32, #tpu.memory_space<vmem>>, vector<8x128xf32>,
    return
  }
}

</mosaic_0001>

<bundles_post_ra>
// kernel: tpu_custom_call.1
= control target key start
LH: loop header
LB: loop body
LE: loop exit
PB: predicated region body
PF: predicated region fallthrough
CT: control target
= control target key end

     0   :  { %12 = vsyncpa [#allocation3], 0  ;;  %s731_s0 = inlined_call_operand.hbm [shape: f32[8,32], index: 0, kind: input, shape index: {}]   ;;  %s732_s1 = inlined_call_operand.hbm [shape: f32[32,64], index: 1, kind: input, shape index: {}]   ;;  %s733_s2 = inlined_call_operand.vmem [shape: f32[1,64], index: 2, kind: input, shape index: {}]   ;;  %s734_s3 = inlined_call_operand.hbm [shape: f32[64,64], index: 3, kind: input, shape index: {}]   ;;  %s735_s4 = inlined_call_operand.vmem [shape: f32[1,64], index: 4, kind: input, shape index: {}]   ;;  %s736_s5 = inlined_call_operand.hbm [shape: f32[64,128], index: 5, kind: input, shape index: {}]   ;;  %s737_s6 = inlined_call_operand.vmem [shape: f32[1,128], index: 6, kind: input, shape index: {}]   ;;  %s738_s7 = inlined_call_operand.hbm [shape: f32[8,128], index: 7, kind: output, shape index: {}]  }
   0x1   :  { %13 = vsyncpa [#allocation6], 0 }
   0x2   :  { %14 = vsyncpa [#allocation9], 0 }
   0x3   :  { %15 = vsyncpa [#allocation4], 0  ;;  %s600_s24 = smov [#allocation5]   ;;  %s482_s28 = scalar_lea.hbm %s732_s1, 512 }
   0x4   :  { %s31_s25 = sshll.u32 %s600_s24, 4  ;;  %p483_p0 = scmp.ne.s32.totalorder %s732_s1, %s482_s28  ;;  %s32_s25 = int_to_ptr.vmem [resolvable:$true] %s31_s25 }
   0x5   :  { %p486_p1 = scmp.lt.u32.totalorder %s482_s28, %s732_s1 }
   0x7   :  { %p488_p2 = pnand %p486_p1, %p483_p0 }
   0x9   :  { %491 = shalt.err (!%p488_p2)
}
   0xa   :  { %s492_s10 = scalar_lea.vmem %s32_s25, 512  ;;  %p497_p4 = scmp.lt.s32.totalorder %s32_s25, %s32_s25 }
   0xb   :  { %p493_p3 = scmp.ne.s32.totalorder %s32_s25, %s492_s10  ;;  %p498_p5 = scmp.lt.s32.totalorder %s492_s10, %s492_s10 }
   0xd   :  { %p499_p6 = por %p498_p5, %p497_p4 }
   0xf   :  { %p500_p7 = pnand %p499_p6, %p493_p3 }
  0x11   :  { %503 = shalt.err (!%p500_p7)
}
  0x12   :  { %s601_s11 = smov 128   ;;  %s602_s12 = smov 8  }
  0x13   :  { %37 = dma.hbm_to_vmem [thread:$0]  %s732_s1, 512, %s32_s25, [#allocation6], %s601_s11, %s601_s11, %s602_s12  }
  0x14   :  { %s603_s15 = smov [#allocation2]   ;;  %s604_s17 = smov [#allocation7]  }
  0x15   :  { %s22_s16 = sshll.u32 %s603_s15, 4  ;;  %s45_s18 = sshll.u32 %s604_s17, 4  ;;  %s23_s16 = int_to_ptr.vmem [resolvable:$true] %s22_s16  ;;  %s46_s18 = int_to_ptr.vmem [resolvable:$true] %s45_s18 }
  0x16   :  { %s504_s21 = scalar_lea.hbm %s731_s0, 128 }
  0x17   :  { %p505_p8 = scmp.ne.s32.totalorder %s731_s0, %s504_s21  ;;  %p508_p9 = scmp.lt.u32.totalorder %s504_s21, %s731_s0 }
  0x19   :  { %p510_p10 = pnand %p508_p9, %p505_p8 }
  0x1b   :  { %513 = shalt.err (!%p510_p10)
}
  0x1c   :  { %s514_s1 = scalar_lea.vmem %s23_s16, 128  ;;  %p519_p12 = scmp.lt.s32.totalorder %s23_s16, %s23_s16 }
  0x1d   :  { %p515_p11 = scmp.ne.s32.totalorder %s23_s16, %s514_s1  ;;  %p520_p13 = scmp.lt.s32.totalorder %s514_s1, %s514_s1 }
  0x1f   :  { %p521_p0 = por %p520_p13, %p519_p12 }
  0x21   :  { %p522_p1 = pnand %p521_p0, %p515_p11 }
  0x23   :  { %525 = shalt.err (!%p522_p1)
}
  0x24   :  { %25 = dma.hbm_to_vmem [thread:$0]  %s731_s0, 128, %s23_s16, [#allocation3]  }
  0x25   :  { %s526_s30 = scalar_lea.hbm %s734_s3, 1024 }
  0x26   :  { %p527_p2 = scmp.ne.s32.totalorder %s734_s3, %s526_s30  ;;  %p530_p3 = scmp.lt.u32.totalorder %s526_s30, %s734_s3 }
  0x28   :  { %p532_p4 = pnand %p530_p3, %p527_p2 }
  0x2a   :  { %535 = shalt.err (!%p532_p4)
}
  0x2b   :  { %s536_s14 = scalar_lea.vmem %s46_s18, 1024  ;;  %p541_p6 = scmp.lt.s32.totalorder %s46_s18, %s46_s18 }
  0x2c   :  { %p537_p5 = scmp.ne.s32.totalorder %s46_s18, %s536_s14  ;;  %p542_p7 = scmp.lt.s32.totalorder %s536_s14, %s536_s14 }
  0x2e   :  { %p543_p8 = por %p542_p7, %p541_p6 }
  0x30   :  { %p544_p9 = pnand %p543_p8, %p537_p5 }
  0x32   :  { %547 = shalt.err (!%p544_p9)
}
  0x33   :  { %51 = dma.hbm_to_vmem [thread:$0]  %s734_s3, 1024, %s46_s18, [#allocation6], %s601_s11, %s601_s11, %s602_s12  }
  0x34   :  { %s605_s16 = smov [#allocation8]   ;;  %s548_s21 = scalar_lea.hbm %s736_s5, 1024 }
  0x35   :  { %s59_s17 = sshll.u32 %s605_s16, 4  ;;  %p549_p10 = scmp.ne.s32.totalorder %s736_s5, %s548_s21  ;;  %s60_s17 = int_to_ptr.vmem [resolvable:$true] %s59_s17 }
  0x36   :  { %p552_p11 = scmp.lt.u32.totalorder %s548_s21, %s736_s5 }
  0x38   :  { %p554_p12 = pnand %p552_p11, %p549_p10 }
  0x3a   :  { %557 = shalt.err (!%p554_p12)
}
  0x3b   :  { %s558_s1 = scalar_lea.vmem %s60_s17, 1024  ;;  %p563_p0 = scmp.lt.s32.totalorder %s60_s17, %s60_s17 }
  0x3c   :  { %p559_p13 = scmp.ne.s32.totalorder %s60_s17, %s558_s1  ;;  %p564_p1 = scmp.lt.s32.totalorder %s558_s1, %s558_s1 }
  0x3e   :  { %p565_p2 = por %p564_p1, %p563_p0 }
  0x40   :  { %p566_p3 = pnand %p565_p2, %p559_p13 }
  0x42   :  { %569 = shalt.err (!%p566_p3)
}
  0x43   :  { %65 = dma.hbm_to_vmem [thread:$0]  %s736_s5, 1024, %s60_s17, [#allocation9], %s601_s11, %s601_s11, %s602_s12  }
  0x44   :  { %592 = dma.done.wait [#allocation3], 128  }
  0x45   :  { %593 = vsyncadd [#allocation3], 4294967168 }
  0x46   :  { %594 = dma.done.wait [#allocation6], 1536  }
  0x47   :  { %595 = vsyncadd [#allocation6], 4294965760 }
  0x48   :  { %596 = dma.done.wait [#allocation9], 1024  }
  0x49   :  { %597 = vsyncadd [#allocation9], 4294966272  ;;  %v606_v0 = vmov 0.0|0.0   ;;  %vm607_vm0 = vmmov 0   ;;  %v608_v1 = vmov 0.0   ;;  %v81_v2 = vld [vmem:[#allocation5] sm:$0xff] }
  0x4a   :  { %442 = vmatprep.subr.bf16.mxu0 %v606_v0  ;;  %401 = vmatprep.mubr.msk.f32.mxu0 %vm607_vm0, %v608_v1  ;;  %v82_v3 = vld [vmem:[#allocation5 + $0x8] sm:$0xff]  ;;  %v83_v4 = vld [vmem:[#allocation5 + $0x10] sm:$0xff]  ;;  %v84_v6 = vld [vmem:[#allocation5 + $0x18] sm:$0xff]  ;;  %vm93_vm1 = vcmask 261120   ;;  %vm183_vm2 = vcmask 523264   ;;  %s609_s28 = smov [#allocation10]  }
  0x4b   :  { %448 = vmatprep.subr.bf16.mxu1 %v606_v0  ;;  %420 = vmatprep.mubr.msk.f32.mxu1 %vm607_vm0, %v608_v1  ;;  %v443_v5 = vpack.c.bf16 %v82_v3, %v81_v2  ;;  %v167_v7 = vld [vmem:[#allocation7] sm:$0xff]  ;;  %v168_v8 = vld [vmem:[#allocation7 + $0x8] sm:$0xff]  ;;  %v169_v9 = vld [vmem:[#allocation7 + $0x10] sm:$0xff]  ;;  %v446_v11 = vpack.c.bf16 %v84_v6, %v83_v4  ;;  %s353_s29 = sshll.u32 %s609_s28, 4  ;;  %s354_s29 = int_to_ptr.vmem [resolvable:$true] %s353_s29 }
  0x4c   :  { %v170_v10 = vld [vmem:[#allocation7 + $0x18] sm:$0xff]  ;;  %v449_v13 = vpack.c.bf16 %v168_v8, %v167_v7  ;;  %v171_v16 = vld [vmem:[#allocation7 + $0x20] sm:$0xff]  ;;  %v172_v17 = vld [vmem:[#allocation7 + $0x28] sm:$0xff]  ;;  %s570_s30 = scalar_lea.vmem %s354_s29, 128  ;;  %p575_p5 = scmp.lt.s32.totalorder %s354_s29, %s354_s29 }
  0x4d   :  { %444 = vmatpush3.bf16.msra.mxu0 %v443_v5  ;;  %v80_v12 = vld [vmem:[#allocation2] sm:$0xff]  ;;  %v452_v14 = vpack.c.bf16 %v170_v10, %v169_v9  ;;  %v455_v18 = vpack.c.bf16 %v172_v17, %v171_v16  ;;  %v173_v19 = vld [vmem:[#allocation7 + $0x30] sm:$0xff]  ;;  %v257_v22 = vld [vmem:[#allocation8] sm:$0xff]  ;;  %p571_p4 = scmp.ne.s32.totalorder %s354_s29, %s570_s30  ;;  %p576_p6 = scmp.lt.s32.totalorder %s570_s30, %s570_s30 }
  0x4e   :  { %445 = vmatprep.subr.bf16.mxu0 %v606_v0  ;;  %450 = vmatpush3.bf16.msra.mxu1 %v449_v13  ;;  %v86_v15 = vmax.f32 %v80_v12, 0.0  ;;  %v174_v20 = vld [vmem:[#allocation7 + $0x38] sm:$0xff]  ;;  %v258_v23 = vld [vmem:[#allocation8 + $0x8] sm:$0xff]  ;;  %v259_v24 = vld [vmem:[#allocation8 + $0x10] sm:$0xff] }
  0x4f   :  { %451 = vmatprep.subr.bf16.mxu1 %v606_v0  ;;  %v458_v21 = vpack.c.bf16 %v174_v20, %v173_v19  ;;  %v461_v25 = vpack.c.bf16 %v258_v23, %v257_v22  ;;  %v260_v26 = vld [vmem:[#allocation8 + $0x18] sm:$0xff]  ;;  %v261_v28 = vld [vmem:[#allocation8 + $0x20] sm:$0xff]  ;;  %v262_v29 = vld [vmem:[#allocation8 + $0x28] sm:$0xff]  ;;  %p577_p7 = por %p576_p6, %p575_p5 }
  0x50   :  { %v464_v27 = vpack.c.bf16 %v260_v26, %v259_v24  ;;  %v467_v30 = vpack.c.bf16 %v262_v29, %v261_v28  ;;  %v364_v31 = vld [vmem:[%s733_s2] ss:$0 sm:$0xff]  ;;  %v263_v36 = vld [vmem:[#allocation8 + $0x30] sm:$0xff] }
  0x51   :  { %447 = vmatpush3.bf16.msra.mxu0 %v446_v11  ;;  %v264_v37 = vld [vmem:[#allocation8 + $0x38] sm:$0xff]  ;;  %p578_p8 = pnand %p577_p7, %p571_p4 }
  0x52   :  { %460 = vmatprep.subr.bf16.mxu0 %v606_v0  ;;  %453 = vmatpush3.bf16.msra.mxu1 %v452_v14  ;;  %v470_v38 = vpack.c.bf16 %v264_v37, %v263_v36  ;;  %v366_v39 = vld [vmem:[%s735_s4] ss:$0 sm:$0xff] }
  0x53   :  { %454 = vmatprep.subr.bf16.mxu1 %v606_v0  ;;  %v368_v44 = vld [vmem:[%s737_s6] ss:$0 sm:$0xff] }
  0x54   :  { %402 = vmatmul.mubr.msk.f32.vlgmr.msra.gmra.mrb[0].mxu0 %vm93_vm1, %v86_v15 }
  0x55   :  { %439 = vmatprep.mubr.msk.f32.mxu0 %vm607_vm0, %v608_v1  ;;  %462 = vmatpush3.bf16.msra.mxu0 %v461_v25 }
  0x56   :  { %456 = vmatpush3.bf16.msra.mxu1 %v455_v18  ;;  %463 = vmatprep.subr.bf16.mxu0 %v606_v0 }
  0x57   :  { %457 = vmatprep.subr.bf16.mxu1 %v606_v0 }
  0x59   :  { %465 = vmatpush3.bf16.msra.mxu0 %v464_v27 }
  0x5a   :  { %459 = vmatpush3.bf16.msra.mxu1 %v458_v21  ;;  %466 = vmatprep.subr.bf16.mxu0 %v606_v0 }
  0x5d   :  { %468 = vmatpush3.bf16.msra.mxu0 %v467_v30 }
  0x5e   :  { %469 = vmatprep.subr.bf16.mxu0 %v606_v0 }
  0x61   :  { %471 = vmatpush3.bf16.msra.mxu0 %v470_v38 }
 0x127   :  { %v163_v32 = vpop.f32.mrb[0].mxu0 }
 0x128   :  { %v164_v33 = vadd.f32 %v364_v31, %v163_v32  ;;  %v403_v34 = vpop.f32.mrb[1].mxu0 }
 0x12a   :  { %v176_v35 = vmax.f32 %v164_v33, 0.0 }
 0x12c   :  { %421 = vmatmul.mubr.msk.f32.vlgmr.msra.gmra.mrb[0].mxu1 %vm183_vm2, %v176_v35 }
 0x1ff   :  { %v253_v40 = vpop.f32.mrb[0].mxu1 }
 0x200   :  { %v254_v41 = vadd.f32 %v366_v39, %v253_v40  ;;  %v422_v42 = vpop.f32.mrb[1].mxu1 }
 0x202   :  { %v266_v43 = vmax.f32 %v254_v41, 0.0 }
 0x204   :  { %440 = vmatmul.mubr.msk.f32.vlgmr.msra.gmra.mrb[2].mxu0 %vm183_vm2, %v266_v43 }
 0x2d7   :  { %v342_v45 = vpop.f32.mrb[2].mxu0 }
 0x2d8   :  { %v343_v46 = vadd.f32 %v368_v44, %v342_v45  ;;  %v441_v47 = vpop.f32.mrb[3].mxu0 }
 0x2da   :  { %346 = vst [vmem:[#allocation10] sm:$0xff] %v343_v46 }
 0x2db   :  { %581 = shalt.err (!%p578_p8)
}
 0x2dc   :  { %s582_s9 = scalar_lea.hbm %s738_s7, 128 }
 0x2dd   :  { %p583_p9 = scmp.ne.s32.totalorder %s738_s7, %s582_s9  ;;  %p586_p10 = scmp.lt.u32.totalorder %s582_s9, %s738_s7 }
 0x2df   :  { %p588_p11 = pnand %p586_p10, %p583_p9 }
 0x2e1   :  { %591 = shalt.err (!%p588_p11)
}
 0x2e2   :  { %356 = dma.vmem_to_hbm [thread:$0]  %s354_s29, 128, %s738_s7, [#allocation4]  }
 0x2e3   :  { %598 = dma.done.wait [#allocation4], 128  }
 0x2e4   :  { %599 = vsyncadd [#allocation4], 4294967168 }
 0x2e5   :  { %360 = vsyncpa [#allocation3], 1 }
 0x2e6   :  { %361 = vsyncpa [#allocation6], 1 }
 0x2e7   :  { %362 = vsyncpa [#allocation9], 1 }
 0x2e8   :  { %363 = vsyncpa [#allocation4], 1 }

</bundles_post_ra>
